<compile_context>
chip_gen: v5e
topology: v5e:2x2
jax: 0.10.0
libtpu: 0.0.40
codegen_flags: <defaults>
</compile_context>

<pallas_src>
import inspect

import jax
import jax.numpy as jnp
from jax import lax
from jax.experimental import pallas as pl
from jax.experimental.pallas import tpu as pltpu

LN_EPS = 1e-12


def _round_up(x, m):
    return ((x + m - 1) // m) * m


def _sublane_multiple(*dtypes):
    """Minimum second-minor tile multiple: 8 (4B), 16 (2B), 32 (1B) dtypes."""
    m = 8
    for dt in dtypes:
        isz = jnp.dtype(dt).itemsize
        m = max(m, 32 // max(int(isz), 1))
    return m


def _vmem_capacity_bytes():
    """Per-TensorCore VMEM capacity; conservative 64 MiB fallback (v7x-sized)."""
    cap = 64 << 20
    if hasattr(pltpu, "get_tpu_info"):
        try:  # host-side query only; never wraps a pallas_call
            cap = int(pltpu.get_tpu_info().vmem_capacity_bytes)
        except Exception:
            pass
    return cap


def _has_buffered_blockspec():
    """Capability check for pl.Buffered + BlockSpec(pipeline_mode=...)."""
    if not hasattr(pl, "Buffered"):
        return False
    try:
        return "pipeline_mode" in inspect.signature(pl.BlockSpec).parameters
    except (TypeError, ValueError):
        return False


def bert_output_kernel(x_ref, w_ref, b_ref, res_ref, gamma_ref, beta_ref, o_ref):
    # x_ref:   (tm, I)  hidden_states tile (native dtype, fed straight to MXU)
    # w_ref:   (I,  H)  dense weight pre-transposed in the wrapper -> plain (K, N) feed
    # b_ref:   (1,  H)  dense bias
    # res_ref: (tm, H)  residual (input_tensor) tile
    # gamma_ref/beta_ref: (1, H)
    # o_ref:   (tm, H)
    #
    # dense: x @ W^T realized as x @ W_t with W_t = (I, H); f32 accumulation on the MXU
    y = jnp.dot(x_ref[...], w_ref[...], preferred_element_type=jnp.float32)
    y = y + b_ref[...].astype(jnp.float32)

    # dropout: identity in eval mode
    # TODO(synk): training-mode dropout via pltpu.prng_seed + pltpu.prng_random_bits
    # on the (tm, H) tile if ever needed (avoids an HBM-resident mask input).

    # residual add (f32)
    y = y + res_ref[...].astype(jnp.float32)

    # TF-style LayerNorm over the last axis (biased variance, eps inside sqrt), f32
    u = jnp.mean(y, axis=-1, keepdims=True)
    d = y - u
    s = jnp.mean(d * d, axis=-1, keepdims=True)
    xn = d * lax.rsqrt(s + LN_EPS)
    out = gamma_ref[...].astype(jnp.float32) * xn + beta_ref[...].astype(jnp.float32)
    o_ref[...] = out.astype(o_ref.dtype)


def _choose_tm(M, I, H, x_isz, r_isz, o_isz, w_bytes, w_bufs, sub,
               tm_max=512, vmem_budget=40 << 20, min_steps=4):
    """Largest row tile (multiple of `sub`, <= tm_max) fitting the VMEM budget,
    while preferring >= min_steps grid steps (>= 2 per v7x TensorCore)."""
    tm = max(sub, min(_round_up(tm_max, sub), _round_up(M, sub)))
    tm = min(tm, max(sub, _round_up(pl.cdiv(M, min_steps), sub)))
    while True:
        need = (w_bufs * w_bytes                 # resident weight (1x if Buffered(1))
                + 2 * tm * I * x_isz             # double-buffered activation tiles
                + 2 * tm * H * r_isz             # double-buffered residual tiles
                + 2 * tm * H * o_isz             # double-buffered output tiles
                + 4 * tm * H * 4                 # f32 LayerNorm temporaries
                + 6 * H * 4)                     # bias/gamma/beta blocks
        if need <= vmem_budget or tm <= sub:
            break
        tm = max(sub, _round_up(tm // 2, sub))
    return tm


def bert_output1(hidden_states, input_tensor, weight, bias, gamma, beta, *, tm=None):
    """hidden_states: [B, S, I], input_tensor: [B, S, H], weight (PyTorch Linear): [H, I]
    -> [B, S, H]."""
    B, S, I = hidden_states.shape
    H = input_tensor.shape[-1]
    assert weight.shape == (H, I)
    M = B * S

    x2 = hidden_states.reshape(M, I)
    r2 = input_tensor.reshape(M, H)
    # One-time XLA transpose of the static inference weight to (K, N) = (I, H):
    # keeps the RHS contraction on the sublane axis so Mosaic never relayouts the
    # full weight inside the grid loop.
    w2 = jnp.transpose(weight)
    b2 = bias.reshape(1, H)
    g2 = gamma.reshape(1, H)
    be2 = beta.reshape(1, H)

    out_dtype = hidden_states.dtype
    sub = _sublane_multiple(x2.dtype, r2.dtype, out_dtype)

    w_bytes = H * I * w2.dtype.itemsize
    use_buffered_w = _has_buffered_blockspec() and w_bytes >= (4 << 20)
    w_bufs = 1 if use_buffered_w else 2

    # Generation-aware VMEM budgeting.
    vmem_cap = _vmem_capacity_bytes()
    if vmem_cap <= (64 << 20):                       # v7x-class: 64 MiB / TensorCore
        tm_budget = max(16 << 20, vmem_cap - (20 << 20))   # ~44 MiB
        vmem_limit_cap = max(32 << 20, vmem_cap - (12 << 20))  # ~52 MiB
    else:                                            # v5e / v6e: 128 MiB
        tm_budget = 96 << 20
        vmem_limit_cap = 100 << 20

    if tm is None:
        tm = _choose_tm(M, I, H, x2.dtype.itemsize, r2.dtype.itemsize,
                        out_dtype.itemsize, w_bytes, w_bufs, sub,
                        vmem_budget=tm_budget)
    tm = max(sub, _round_up(min(tm, _round_up(M, sub)), sub))

    # No wrapper-side padding: rely on Pallas partial last-block handling
    # (matmul + LayerNorm are row-independent; OOB output rows are masked).
    grid = (pl.cdiv(M, tm),)

    vmem_needed = (w_bufs * w_bytes
                   + 2 * tm * I * x2.dtype.itemsize
                   + 2 * tm * H * r2.dtype.itemsize
                   + 2 * tm * H * out_dtype.itemsize
                   + 4 * tm * H * 4
                   + 6 * H * 4)
    vmem_limit = int(min(max(vmem_needed + (8 << 20), 32 << 20), vmem_limit_cap))

    if use_buffered_w:
        # Weight block index never changes; single-buffer it to save VMEM.
        w_spec = pl.BlockSpec((I, H), lambda i: (0, 0), pipeline_mode=pl.Buffered(1))
    else:
        w_spec = pl.BlockSpec((I, H), lambda i: (0, 0))

    out = pl.pallas_call(
        bert_output_kernel,
        out_shape=jax.ShapeDtypeStruct((M, H), out_dtype),
        grid_spec=pltpu.PrefetchScalarGridSpec(
            num_scalar_prefetch=0,
            grid=grid,
            in_specs=[
                pl.BlockSpec((tm, I), lambda i: (i, 0)),   # hidden_states tile
                w_spec,                                    # weight (full, resident)
                pl.BlockSpec((1, H), lambda i: (0, 0)),    # bias
                pl.BlockSpec((tm, H), lambda i: (i, 0)),   # residual tile
                pl.BlockSpec((1, H), lambda i: (0, 0)),    # gamma
                pl.BlockSpec((1, H), lambda i: (0, 0)),    # beta
            ],
            out_specs=pl.BlockSpec((tm, H), lambda i: (i, 0)),
        ),
        compiler_params=pltpu.CompilerParams(
            dimension_semantics=("parallel",),
            vmem_limit_bytes=vmem_limit,
        ),
    )(x2, w2, b2, r2, g2, be2)

    return out.reshape(B, S, H)


def reference(hidden_states, input_tensor, weight, bias, gamma, beta):
    x = hidden_states.astype(jnp.float32)
    w = weight.astype(jnp.float32)
    y = jnp.einsum("bsi,hi->bsh", x, w, precision=lax.Precision.HIGHEST)
    y = y + bias.astype(jnp.float32)
    y = y + input_tensor.astype(jnp.float32)
    u = jnp.mean(y, axis=-1, keepdims=True)
    s = jnp.mean((y - u) ** 2, axis=-1, keepdims=True)
    y = (y - u) / jnp.sqrt(s + LN_EPS)
    return gamma.astype(jnp.float32) * y + beta.astype(jnp.float32)


if __name__ == "__main__":
    key = jax.random.PRNGKey(0)
    ks = jax.random.split(key, 6)

    H, I = 128, 512  # hidden_size=128 (lane-dense output), intermediate_size=512

    def make_inputs(B, S, dtype):
        hs = jax.random.normal(ks[0], (B, S, I), dtype=jnp.float32).astype(dtype)
        it = jax.random.normal(ks[1], (B, S, H), dtype=jnp.float32).astype(dtype)
        w = (0.02 * jax.random.normal(ks[2], (H, I), dtype=jnp.float32)).astype(dtype)
        b = (0.01 * jax.random.normal(ks[3], (H,), dtype=jnp.float32)).astype(dtype)
        g = (1.0 + 0.1 * jax.random.normal(ks[4], (H,), dtype=jnp.float32)).astype(dtype)
        be = (0.05 * jax.random.normal(ks[5], (H,), dtype=jnp.float32)).astype(dtype)
        return hs, it, w, b, g, be

    # 1) f32, rows divide the tile exactly
    args = make_inputs(2, 8, jnp.float32)
    out = jax.block_until_ready(bert_output1(*args))
    ref = reference(*args)
    assert out.shape == (2, 8, H)
    assert jnp.allclose(out.astype(jnp.float32), ref, atol=1e-3, rtol=1e-3), "f32 mismatch"

    # 2) f32, rows do NOT divide the tile (partial last block, no wrapper-side padding)
    args = make_inputs(2, 9, jnp.float32)
    out = jax.block_until_ready(bert_output1(*args))
    ref = reference(*args)
    assert out.shape == (2, 9, H)
    assert jnp.allclose(out.astype(jnp.float32), ref, atol=1e-3, rtol=1e-3), "partial-block mismatch"

    # 3) bf16 operands fed to the MXU (f32 accumulation + f32 LayerNorm inside)
    args = make_inputs(2, 16, jnp.bfloat16)
    out = jax.block_until_ready(bert_output1(*args))
    ref = reference(*args)
    assert out.shape == (2, 16, H)
    assert out.dtype == jnp.bfloat16
    assert jnp.allclose(out.astype(jnp.float32), ref, atol=3e-2, rtol=3e-2), "bf16 mismatch"

    print("KERNEL_OK")
</pallas_src>

<mosaic_0001>
module attributes {stable_mosaic.version = 11 : i64} {
  func.func @bert_output_kernel(%arg0: i32, %arg1: memref<8x512xf32, #tpu.memory_space<vmem>>, %arg2: memref<512x128xf32, #tpu.memory_space<vmem>>, %arg3: memref<1x128xf32, #tpu.memory_space<vmem>>, %arg4: memref<8x128xf32, #tpu.memory_space<vmem>>, %arg5: memref<1x128xf32, #tpu.memory_space<vmem>>, %arg6: memref<1x128xf32, #tpu.memory_space<vmem>>, %arg7: memref<8x128xf32, #tpu.memory_space<vmem>>) attributes {dimension_semantics = [#tpu.dimension_semantics<parallel>], iteration_bounds = array<i64: 2>, scalar_prefetch = 0 : i64, scratch_operands = 0 : i64, tpu.core_type = #tpu.core_type<tc>, window_params = [{transform_indices = @transform_0, window_bounds = array<i64: 8, 512>}, {pipeline_mode = #tpu.pipeline_mode<synchronous>, transform_indices = @transform_1, window_bounds = array<i64: 512, 128>}, {pipeline_mode = #tpu.pipeline_mode<synchronous>, transform_indices = @transform_2, window_bounds = array<i64: 1, 128>}, {transform_indices = @transform_3, window_bounds = array<i64: 8, 128>}, {pipeline_mode = #tpu.pipeline_mode<synchronous>, transform_indices = @transform_4, window_bounds = array<i64: 1, 128>}, {pipeline_mode = #tpu.pipeline_mode<synchronous>, transform_indices = @transform_5, window_bounds = array<i64: 1, 128>}, {transform_indices = @transform_6, window_bounds = array<i64: 8, 128>}]} {
    %c0 = arith.constant 0 : index
    %c0_0 = arith.constant 0 : index
    %0 = vector.load %arg1[%c0, %c0_0] : memref<8x512xf32, #tpu.memory_space<vmem>>, vector<8x512xf32>
    %c0_1 = arith.constant 0 : index
    %c0_2 = arith.constant 0 : index
    %1 = vector.load %arg2[%c0_1, %c0_2] : memref<512x128xf32, #tpu.memory_space<vmem>>, vector<512x128xf32>
    %cst = arith.constant dense<0.000000e+00> : vector<8x128xf32>
    %2 = tpu.matmul %0, %1, %cst {dimension_numbers = #tpu.dot_dimension_numbers<[1], [0], [0], [1], [0, 0, 1, 1], [], []>} : vector<8x512xf32>, vector<512x128xf32>, vector<8x128xf32> -> vector<8x128xf32>
    %c0_3 = arith.constant 0 : index
    %c0_4 = arith.constant 0 : index
    %3 = vector.load %arg3[%c0_3, %c0_4] : memref<1x128xf32, #tpu.memory_space<vmem>>, vector<1x128xf32>
    %4 = vector.broadcast %3 : vector<1x128xf32> to vector<8x128xf32>
    %5 = arith.addf %2, %4 : vector<8x128xf32>
    %c0_5 = arith.constant 0 : index
    %c0_6 = arith.constant 0 : index
    %6 = vector.load %arg4[%c0_5, %c0_6] : memref<8x128xf32, #tpu.memory_space<vmem>>, vector<8x128xf32>
    %7 = arith.addf %5, %6 : vector<8x128xf32>
    %cst_7 = arith.constant dense<0.000000e+00> : vector<8xf32>
    %8 = vector.multi_reduction <add>, %7, %cst_7 [1] : vector<8x128xf32> to vector<8xf32>
    %9 = vector.shape_cast %8 : vector<8xf32> to vector<8x1xf32>
    %cst_8 = arith.constant 1.280000e+02 : f32
    %10 = vector.broadcast %cst_8 : f32 to vector<8x1xf32>
    %11 = arith.divf %9, %10 : vector<8x1xf32>
    %12 = vector.broadcast %11 : vector<8x1xf32> to vector<8x128xf32>
    %13 = arith.subf %7, %12 : vector<8x128xf32>
    %14 = arith.mulf %13, %13 : vector<8x128xf32>
    %cst_9 = arith.constant dense<0.000000e+00> : vector<8xf32>
    %15 = vector.multi_reduction <add>, %14, %cst_9 [1] : vector<8x128xf32> to vector<8xf32>
    %16 = vector.shape_cast %15 : vector<8xf32> to vector<8x1xf32>
    %cst_10 = arith.constant 1.280000e+02 : f32
    %17 = vector.broadcast %cst_10 : f32 to vector<8x1xf32>
    %18 = arith.divf %16, %17 : vector<8x1xf32>
    %cst_11 = arith.constant 9.99999996E-13 : f32
    %19 = vector.broadcast %cst_11 : f32 to vector<8x1xf32>
    %20 = arith.addf %18, %19 : vector<8x1xf32>
    %21 = math.rsqrt %20 : vector<8x1xf32>
    %22 = vector.broadcast %21 : vector<8x1xf32> to vector<8x128xf32>
    %23 = arith.mulf %13, %22 : vector<8x128xf32>
    %c0_12 = arith.constant 0 : index
    %c0_13 = arith.constant 0 : index
    %24 = vector.load %arg5[%c0_12, %c0_13] : memref<1x128xf32, #tpu.memory_space<vmem>>, vector<1x128xf32>
    %25 = vector.broadcast %24 : vector<1x128xf32> to vector<8x128xf32>
    %26 = arith.mulf %25, %23 : vector<8x128xf32>
    %c0_14 = arith.constant 0 : index
    %c0_15 = arith.constant 0 : index
    %27 = vector.load %arg6[%c0_14, %c0_15] : memref<1x128xf32, #tpu.memory_space<vmem>>, vector<1x128xf32>
    %28 = vector.broadcast %27 : vector<1x128xf32> to vector<8x128xf32>
    %29 = arith.addf %26, %28 : vector<8x128xf32>
    %c0_16 = arith.constant 0 : index
    %c0_17 = arith.constant 0 : index
    %30 = vector.load %arg7[%c0_16, %c0_17] : memref<8x128xf32, #tpu.memory_space<vmem>>, vector<8x128xf32>
    tpu.vector_store %arg7[%c0_16, %c0_17], %29 {strides = array<i32>} : memref<8x128xf32, #tpu.memory_space<vmem>>, vector<8x128xf32>,
    return
  }
  func.func @transform_0(%arg0: i32) -> (i32, i32) {
    %c0_i32 = arith.constant 0 : i32
    %c0_i32_0 = arith.constant 0 : i32
    return %arg0, %c0_i32 : i32, i32
  }
  func.func @transform_1(%arg0: i32) -> (i32, i32) {
    %c0_i32 = arith.constant 0 : i32
    %c0_i32_0 = arith.constant 0 : i32
    %c0_i32_1 = arith.constant 0 : i32
    return %c0_i32, %c0_i32_0 : i32, i32
  }
  func.func @transform_2(%arg0: i32) -> (i32, i32) {
    %c0_i32 = arith.constant 0 : i32
    %c0_i32_0 = arith.constant 0 : i32
    %c0_i32_1 = arith.constant 0 : i32
    return %c0_i32, %c0_i32_0 : i32, i32
  }
  func.func @transform_3(%arg0: i32) -> (i32, i32) {
    %c0_i32 = arith.constant 0 : i32
    %c0_i32_0 = arith.constant 0 : i32
    return %arg0, %c0_i32 : i32, i32
  }
  func.func @transform_4(%arg0: i32) -> (i32, i32) {
    %c0_i32 = arith.constant 0 : i32
    %c0_i32_0 = arith.constant 0 : i32
    %c0_i32_1 = arith.constant 0 : i32
    return %c0_i32, %c0_i32_0 : i32, i32
  }
  func.func @transform_5(%arg0: i32) -> (i32, i32) {
    %c0_i32 = arith.constant 0 : i32
    %c0_i32_0 = arith.constant 0 : i32
    %c0_i32_1 = arith.constant 0 : i32
    return %c0_i32, %c0_i32_0 : i32, i32
  }
  func.func @transform_6(%arg0: i32) -> (i32, i32) {
    %c0_i32 = arith.constant 0 : i32
    %c0_i32_0 = arith.constant 0 : i32
    return %arg0, %c0_i32 : i32, i32
  }
}

</mosaic_0001>

<bundles_post_ra>
// kernel: tpu_custom_call.1
= control target key start
LH: loop header
LB: loop body
LE: loop exit
PB: predicated region body
PF: predicated region fallthrough
CT: control target
= control target key end

     0   :  { %s1132_s0 = inlined_call_operand.hbm [shape: f32[16,512], index: 0, kind: input, shape index: {}]   ;;  %s1133_s1 = inlined_call_operand.hbm [shape: f32[512,128], index: 1, kind: input, shape index: {}]   ;;  %s1134_s2 = inlined_call_operand.vmem [shape: f32[1,128], index: 2, kind: input, shape index: {}]   ;;  %s1135_s3 = inlined_call_operand.hbm [shape: f32[16,128], index: 3, kind: input, shape index: {}]   ;;  %s1136_s4 = inlined_call_operand.vmem [shape: f32[1,128], index: 4, kind: input, shape index: {}]   ;;  %s1137_s5 = inlined_call_operand.vmem [shape: f32[1,128], index: 5, kind: input, shape index: {}]   ;;  %s1138_s6 = inlined_call_operand.hbm [shape: f32[16,128], index: 6, kind: output, shape index: {}]  }
   0x1   :  { %1142 = sst [smem:[#allocation16_spill]] %s1132_s0 }
   0x2   :  { %1143 = sst [smem:[#allocation17_spill]] %s1133_s1 }
   0x3   :  { %11 = vsyncpa [#allocation3], 0 }
   0x4   :  { %13 = vsyncpa [#allocation3 + $0x1], 0 }
   0x5   :  { %14 = vsyncpa [#allocation6], 0 }
   0x6   :  { %15 = vsyncpa [#allocation4], 0 }
   0x7   :  { %17 = vsyncpa [#allocation4 + $0x1], 0  ;;  %s927_s21 = smov 0   ;;  %s929_s22 = smov 0  }
   0x8   :  { %s931_s23 = smov 0   ;;  %s933_s24 = smov 0  }
   0x9 LB: > { %1144 = sst [smem:[#allocation13_spill]] %s882_s23  ;;  %s948_s25 = sadd.s32 4294967295, %s886_s24   ;;  %s886_s24 = sphi %s933_s24, %s1157_s24   ;;  %s882_s23 = sphi %s931_s23, %s1159_s23   ;;  %s878_s22 = sphi %s929_s22, %s1161_s22   ;;  %s874_s21 = sphi %s927_s21, %s1160_s21  }
   0xa   : > { %s631_s26 = sadd.s32 4294967294, %s886_s24   ;;  %s952_s27 = sadd.s32 1, %s886_s24  }
   0xb   : > { %1145 = sst [smem:[#allocation14_spill]] %s952_s27  ;;  %s30_s28 = sadd.s32 1, %s882_s23 }
   0xc   : > { %s27_s29 = ssub.s32 %s886_s24, %s952_s27  ;;  %p37_p0 = scmp.ne.s32.totalorder %s882_s23, %s878_s22 }
   0xd   : > { %p28_p1 = scmp.eq.s32.totalorder %s27_s29, 0  ;;  %p38_p2 = scmp.eq.s32.totalorder %s886_s24, 0 }
   0xe   : > { %p43_p3 = scmp.ne.s32.totalorder %s878_s22, %s874_s21  ;;  %p177_p4 = scmp.eq.s32.totalorder %s948_s25, 1 }
   0xf   : > { %s964_s30 = scalar_select %p28_p1, %s882_s23, %s30_s28  }
  0x10   : > { %p966_p5 = por %p38_p2, %p37_p0  ;;  %p970_p6 = por %p177_p4, %p37_p0 }
  0x11   : > { %1146 = sst [smem:[#allocation15_spill]] %s964_s30  ;;  %p183_p7 = scmp.eq.s32.totalorder %s631_s26, 1 }
  0x12   : > { %p676_p9 = scmp.lt.s32.totalorder %s886_s24, 2  ;;  %s226_s10 = sand.u32 1, %s886_s24  }
  0x13   : > { %p979_p10 = por %p183_p7, %p43_p3  ;;  %s228_s11 = sand.u32 1, %s882_s23  }
  0x14   : > { %s635_s12 = sshll.u32 %s228_s11, 5  ;;  %s649_s13 = sshll.u32 %s886_s24, 5 }
  0x15   : > { %s1150_s0 = sld [smem:[#allocation16_spill]]  ;;  %s230_s18 = scalar_lea.vmem [#allocation2], %s635_s12 }
  0x16   : > { %s239_s19 = sshll.u32 %s230_s18, 4  ;;  %p991_p11 = pnand %p676_p9, %p966_p5  ;;  %s240_s19 = int_to_ptr.vmem [resolvable:$true] %s239_s19 }
  0x17   : > { %s995_s26 = sshll.u32 %s228_s11, 3  ;;  %p44_p12 = scmp.eq.s32.totalorder %s948_s25, 0 }
  0x18   : > { %p190_p0 = scmp.lt.s32.totalorder %s886_s24, 3  ;;  %s1000_s28 = scalar_lea.sflag [#allocation3], %s226_s10 }
  0x19   : > { %p726_p2 = pneg %p991_p11 }
  0x1b   : > { %s235_s16 = scalar_lea.hbm %s1150_s0, %s649_s13  ;;  %s729_s11 = scalar_lea.hbm %s1150_s0, 64 }
  0x1c   : > { %s237_s17 = sshll.u32 %s235_s16, 4  ;;  %s238_s17 = int_to_ptr.hbm [resolvable:$true] %s237_s17 }
  0x1d   : > { %s722_s29 = sshra.s32 %s238_s17, 4  ;;  %s723_s29 = int_to_ptr.hbm [resolvable:$true] %s722_s29 }
  0x1e   : > { %s724_s12 = scalar_lea.hbm %s723_s29, 32  ;;  %p730_p7 = scmp.lt.s32.totalorder %s723_s29, %s1150_s0 }
  0x1f   : > { %p725_p1 = scmp.ne.s32.totalorder %s723_s29, %s724_s12  ;;  %p731_p9 = scmp.lt.s32.totalorder %s729_s11, %s724_s12 }
  0x21   : > { %p727_p4 = pnand %p726_p2, %p725_p1  ;;  %p732_p8 = por %p731_p9, %p730_p7 }
  0x23   : > { %p728_p5 = pneg %p727_p4 }
  0x25   : > { %p733_p13 = pnand %p732_p8, %p728_p5 }
  0x27   : > { %736 = shalt.err (!%p733_p13)
}
  0x28   : > { %667 = dma.hbm_to_vmem [thread:$0]  (!%p991_p11), %s238_s17, 512, %s240_s19, %s1000_s28  }
  0x29   : > { %p1021_p1 = por %p44_p12, %p43_p3  ;;  %p1153_p8 = scmp.ge.s32.totalorder %s886_s24, 1 }
  0x2a   : > { %s1155_s1 = sld [smem:[#allocation17_spill]]  ;;  %s888_s17 = smov [#allocation5]  }
  0x2b   : > { %p1029_p13 = pnand %p1153_p8, %p190_p0  ;;  %s203_s19 = sshll.u32 %s888_s17, 4  ;;  %s204_s19 = int_to_ptr.vmem [resolvable:$true] %s203_s19 }
  0x2c   : > { %s639_s7 = sshll.u32 %s886_s24, 3  ;;  %s889_s13 = smov 128  }
  0x2d   : > { %p660_p4 = pneg %p1029_p13  ;;  %s890_s11 = smov 8  }
  0x2e   : > { %s254_s0 = scalar_lea.hbm %s1135_s3, %s639_s7  ;;  %s250_s18 = scalar_lea.vmem [#allocation7], %s995_s26 }
  0x2f   : > { %p661_p3 = pnand %p660_p4, %p44_p12  ;;  %s258_s29 = sshll.u32 %s250_s18, 4  ;;  %s259_s29 = int_to_ptr.vmem [resolvable:$true] %s258_s29 }
  0x30   : > { %s201_s12 = sshll.u32 %s1155_s1, 4  ;;  %s256_s1 = sshll.u32 %s254_s0, 4  ;;  %s202_s12 = int_to_ptr.hbm [resolvable:$true] %s201_s12  ;;  %s257_s1 = int_to_ptr.hbm [resolvable:$true] %s256_s1 }
  0x31   : > { %663 = dma.hbm_to_vmem [thread:$0]  (!%p661_p3), %s202_s12, 8192, %s204_s19, [#allocation6], %s889_s13, %s889_s13, %s890_s11  }
  0x32   : > { %s782_s30 = sshra.s32 %s257_s1, 4  ;;  %s789_s12 = scalar_lea.hbm %s1135_s3, 16  ;;  %s783_s30 = int_to_ptr.hbm [resolvable:$true] %s782_s30 }
  0x33   : > { %s784_s17 = scalar_lea.hbm %s783_s30, 8  ;;  %p790_p9 = scmp.lt.s32.totalorder %s783_s30, %s1135_s3 }
  0x34   : > { %p785_p0 = scmp.ne.s32.totalorder %s783_s30, %s784_s17  ;;  %p791_p8 = scmp.lt.s32.totalorder %s789_s12, %s784_s17 }
  0x36   : > { %p787_p5 = pnand %p785_p0, %p726_p2  ;;  %p792_p4 = por %p791_p8, %p790_p9 }
  0x38   : > { %p788_p7 = pneg %p787_p5 }
  0x3a   : > { %p793_p3 = pnand %p792_p4, %p788_p7 }
  0x3c   : > { %796 = shalt.err (!%p793_p3)
}
  0x3d   : > { %670 = dma.hbm_to_vmem [thread:$0]  (!%p991_p11), %s257_s1, 128, %s259_s29, %s1000_s28  }
  0x3e   : > { %267 = sbr.rel (%p1029_p13) target bundleno = 513 (0x201), region = 44  ;;  %s269_s0 = sand.u32 (!%p1029_p13), 1, %s948_s25  }
  0x3f   : > { %s1061_s23 = sand.u32 (!%p1029_p13), 1, %s878_s22   ;;  %s270_s30 = scalar_lea.sflag (!%p1029_p13), [#allocation3], %s269_s0 }
  0x40   : > { %s641_s27 = sshll.u32 (!%p1029_p13), %s1061_s23, 5 }
  0x41   : > { %s1064_s26 = scalar_lea.vmem (!%p1029_p13), [#allocation2], %s641_s27 }
  0x43   : > { %857 = dma.done.wait (%p1021_p1), %s270_s30, 512  }
  0x44   : > { %859 = vsyncadd (%p1021_p1), %s270_s30, 4294966784 }
  0x45   : > { %861 = dma.done.wait (%p44_p12), [#allocation6], 8192  }
  0x46   : > { %863 = vsyncadd (%p44_p12), [#allocation6], 4294959104  ;;  %s643_s1 = sshll.u32 %s1061_s23, 3 }
  0x47   : > { %s1077_s20 = scalar_lea.vmem [#allocation7], %s643_s1 }
  0x48   : > { %865 = dma.done.wait (%p1021_p1), %s270_s30, 128  }
  0x49   : > { %867 = vsyncadd (%p1021_p1), %s270_s30, 4294967168  ;;  %v374_v0 = vld [vmem:[#allocation5 + $0x178] sm:$0xff]  ;;  %v373_v2 = vld [vmem:[#allocation5 + $0x170] sm:$0xff]  ;;  %s646_s16 = sshll.u32 %s948_s25, 3  ;;  %s322_s25 = scalar_lea.vmem [#allocation8], %s643_s1 }
  0x4a   : > { %v342_v1 = vld [vmem:[#allocation5 + $0x78] sm:$0xff]  ;;  %435 = vmatpush.msra.mxu2 %v374_v0  ;;  %v341_v4 = vld [vmem:[#allocation5 + $0x70] sm:$0xff]  ;;  %v372_v6 = vld [vmem:[#allocation5 + $0x168] sm:$0xff]  ;;  %s526_s18 = scalar_lea.hbm %s1138_s6, %s646_s16  ;;  %s528_s12 = sshll.u32 %s322_s25, 4  ;;  %s529_s12 = int_to_ptr.vmem [resolvable:$true] %s528_s12 }
  0x4b   : > { %395 = vmatpush.msra.mxu0 %v342_v1  ;;  %v390_v3 = vld [vmem:[#allocation5 + $0x1f8] sm:$0xff]  ;;  %v389_v7 = vld [vmem:[#allocation5 + $0x1f0] sm:$0xff]  ;;  %v340_v8 = vld [vmem:[#allocation5 + $0x68] sm:$0xff]  ;;  %s530_s19 = sshll.u32 %s526_s18, 4  ;;  %s516_s13 = scalar_lea.sflag [#allocation4], %s1061_s23  ;;  %s531_s19 = int_to_ptr.hbm [resolvable:$true] %s530_s19 }
  0x4c   : > { %v358_v5 = vld [vmem:[#allocation5 + $0xf8] sm:$0xff]  ;;  %455 = vmatpush.msra.mxu3 %v390_v3  ;;  %436 = vmatpush.msra.mxu2 %v373_v2  ;;  %v357_v9 = vld [vmem:[#allocation5 + $0xf0] sm:$0xff]  ;;  %v388_v10 = vld [vmem:[#allocation5 + $0x1e8] sm:$0xff]  ;;  %s826_s0 = sshra.s32 %s531_s19, 4  ;;  %s827_s0 = int_to_ptr.hbm [resolvable:$true] %s826_s0 }
  0x4d   : > { %415 = vmatpush.msra.mxu1 %v358_v5  ;;  %396 = vmatpush.msra.mxu0 %v341_v4  ;;  %v371_v11 = vld [vmem:[#allocation5 + $0x160] sm:$0xff]  ;;  %v356_v13 = vld [vmem:[#allocation5 + $0xe8] sm:$0xff]  ;;  %v370_v16 = vld [vmem:[#allocation5 + $0x158] sm:$0xff]  ;;  %s828_s27 = scalar_lea.hbm %s827_s0, 8  ;;  %p833_p1 = scmp.lt.s32.totalorder %s827_s0, %s1138_s6 }
  0x4e   : > { %456 = vmatpush.msra.mxu3 %v389_v7  ;;  %v339_v12 = vld [vmem:[#allocation5 + $0x60] sm:$0xff]  ;;  %437 = vmatpush.msra.mxu2 %v372_v6  ;;  %v338_v17 = vld [vmem:[#allocation5 + $0x58] sm:$0xff]  ;;  %v369_v20 = vld [vmem:[#allocation5 + $0x150] sm:$0xff]  ;;  %p829_p11 = scmp.ne.s32.totalorder %s827_s0, %s828_s27 }
  0x4f   : > { %416 = vmatpush.msra.mxu1 %v357_v9  ;;  %397 = vmatpush.msra.mxu0 %v340_v8  ;;  %v387_v14 = vld [vmem:[#allocation5 + $0x1e0] sm:$0xff]  ;;  %v386_v18 = vld [vmem:[#allocation5 + $0x1d8] sm:$0xff]  ;;  %v337_v21 = vld [vmem:[#allocation5 + $0x50] sm:$0xff] }
  0x50   : > { %v355_v15 = vld [vmem:[#allocation5 + $0xe0] sm:$0xff]  ;;  %457 = vmatpush.msra.mxu3 %v388_v10  ;;  %438 = vmatpush.msra.mxu2 %v371_v11  ;;  %v354_v19 = vld [vmem:[#allocation5 + $0xd8] sm:$0xff]  ;;  %v385_v22 = vld [vmem:[#allocation5 + $0x1d0] sm:$0xff]  ;;  %p830_p12 = pnand %p829_p11, %p970_p6 }
  0x51   : > { %417 = vmatpush.msra.mxu1 %v356_v13  ;;  %398 = vmatpush.msra.mxu0 %v339_v12  ;;  %v353_v23 = vld [vmem:[#allocation5 + $0xd0] sm:$0xff]  ;;  %v368_v24 = vld [vmem:[#allocation5 + $0x148] sm:$0xff]  ;;  %v367_v28 = vld [vmem:[#allocation5 + $0x140] sm:$0xff] }
  0x52   : > { %458 = vmatpush.msra.mxu3 %v387_v14  ;;  %439 = vmatpush.msra.mxu2 %v370_v16  ;;  %v336_v25 = vld [vmem:[#allocation5 + $0x48] sm:$0xff]  ;;  %v335_v29 = vld [vmem:[#allocation5 + $0x40] sm:$0xff]  ;;  %v366_v32 = vld [vmem:[#allocation5 + $0x138] sm:$0xff]  ;;  %p831_p2 = pneg %p830_p12 }
  0x53   : > { %418 = vmatpush.msra.mxu1 %v355_v15  ;;  %399 = vmatpush.msra.mxu0 %v338_v17  ;;  %v384_v26 = vld [vmem:[#allocation5 + $0x1c8] sm:$0xff]  ;;  %v383_v30 = vld [vmem:[#allocation5 + $0x1c0] sm:$0xff]  ;;  %v334_v33 = vld [vmem:[#allocation5 + $0x38] sm:$0xff]  ;;  %v891_v15 = vmov 128.0  }
  0x54   : > { %459 = vmatpush.msra.mxu3 %v386_v18  ;;  %440 = vmatpush.msra.mxu2 %v369_v20  ;;  %v352_v27 = vld [vmem:[#allocation5 + $0xc8] sm:$0xff]  ;;  %v351_v31 = vld [vmem:[#allocation5 + $0xc0] sm:$0xff]  ;;  %v382_v34 = vld [vmem:[#allocation5 + $0x1b8] sm:$0xff]  ;;  %718 = vrcp.f32 %v891_v15 }
  0x55   : > { %419 = vmatpush.msra.mxu1 %v354_v19  ;;  %400 = vmatpush.msra.mxu0 %v337_v21  ;;  %v350_v35 = vld [vmem:[#allocation5 + $0xb8] sm:$0xff]  ;;  %v365_v36 = vld [vmem:[#allocation5 + $0x130] sm:$0xff]  ;;  %v364_v40 = vld [vmem:[#allocation5 + $0x128] sm:$0xff] }
  0x56   : > { %460 = vmatpush.msra.mxu3 %v385_v22  ;;  %441 = vmatpush.msra.mxu2 %v368_v24  ;;  %v333_v37 = vld [vmem:[#allocation5 + $0x30] sm:$0xff]  ;;  %v332_v41 = vld [vmem:[#allocation5 + $0x28] sm:$0xff]  ;;  %v363_v44 = vld [vmem:[#allocation5 + $0x120] sm:$0xff] }
  0x57   : > { %420 = vmatpush.msra.mxu1 %v353_v23  ;;  %401 = vmatpush.msra.mxu0 %v336_v25  ;;  %v381_v38 = vld [vmem:[#allocation5 + $0x1b0] sm:$0xff]  ;;  %v380_v42 = vld [vmem:[#allocation5 + $0x1a8] sm:$0xff]  ;;  %v331_v45 = vld [vmem:[#allocation5 + $0x20] sm:$0xff] }
  0x58   : > { %461 = vmatpush.msra.mxu3 %v384_v26  ;;  %442 = vmatpush.msra.mxu2 %v367_v28  ;;  %v349_v39 = vld [vmem:[#allocation5 + $0xb0] sm:$0xff]  ;;  %v348_v43 = vld [vmem:[#allocation5 + $0xa8] sm:$0xff]  ;;  %v362_v46 = vld [vmem:[#allocation5 + $0x118] sm:$0xff] }
  0x59   : > { %421 = vmatpush.msra.mxu1 %v352_v27  ;;  %402 = vmatpush.msra.mxu0 %v335_v29  ;;  %v379_v47 = vld [vmem:[#allocation5 + $0x1a0] sm:$0xff]  ;;  %v330_v49 = vld [vmem:[#allocation5 + $0x18] sm:$0xff]  ;;  %v361_v52 = vld [vmem:[#allocation5 + $0x110] sm:$0xff] }
  0x5a   : > { %462 = vmatpush.msra.mxu3 %v383_v30  ;;  %443 = vmatpush.msra.mxu2 %v366_v32  ;;  %v347_v48 = vld [vmem:[#allocation5 + $0xa0] sm:$0xff]  ;;  %v378_v50 = vld [vmem:[#allocation5 + $0x198] sm:$0xff]  ;;  %v329_v53 = vld [vmem:[#allocation5 + $0x10] sm:$0xff]  ;;  %v719_v16 = vpop.eup %718 }
  0x5b   : > { %422 = vmatpush.msra.mxu1 %v351_v31  ;;  %403 = vmatpush.msra.mxu0 %v334_v33  ;;  %v346_v51 = vld [vmem:[#allocation5 + $0x98] sm:$0xff]  ;;  %v377_v54 = vld [vmem:[#allocation5 + $0x190] sm:$0xff]  ;;  %v360_v56 = vld [vmem:[#allocation5 + $0x108] sm:$0xff]  ;;  %v480_v17 = vmul.f32 128.0, %v719_v16  ;;  %vm484_vm0 = vweird.f32 %v719_v16 }
  0x5c   : > { %463 = vmatpush.msra.mxu3 %v382_v34  ;;  %444 = vmatpush.msra.mxu2 %v365_v36  ;;  %v345_v55 = vld [vmem:[#allocation5 + $0x90] sm:$0xff]  ;;  %v328_v57 = vld [vmem:[#allocation5 + $0x8] sm:$0xff]  ;;  %v359_v60 = vld [vmem:[#allocation5 + $0x100] sm:$0xff] }
  0x5d   : > { %423 = vmatpush.msra.mxu1 %v350_v35  ;;  %404 = vmatpush.msra.mxu0 %v333_v37  ;;  %v376_v58 = vld [vmem:[#allocation5 + $0x188] sm:$0xff]  ;;  %v327_v61 = vld [vmem:[#allocation5] sm:$0xff]  ;;  %v325_v62 = vld [vmem:[%s1064_s26 + $0x10] sm:$0xff]  ;;  %v481_v18 = vsub.f32 1.0, %v480_v17 }
  0x5e   : > { %464 = vmatpush.msra.mxu3 %v381_v38  ;;  %445 = vmatpush.msra.mxu2 %v364_v40  ;;  %v344_v59 = vld [vmem:[#allocation5 + $0x88] sm:$0xff]  ;;  %v375_v63 = vld [vmem:[#allocation5 + $0x180] sm:$0xff]  ;;  %v326_v1 = vld [vmem:[%s1064_s26 + $0x18] sm:$0xff] }
  0x5f   : > { %424 = vmatpush.msra.mxu1 %v349_v39  ;;  %405 = vmatpush.msra.mxu0 %v332_v41  ;;  %v323_v0 = vld [vmem:[%s1064_s26] sm:$0xff]  ;;  %v324_v3 = vld [vmem:[%s1064_s26 + $0x8] sm:$0xff]  ;;  %v482_v19 = vmul.f32 %v719_v16, %v481_v18 }
  0x60   : > { %465 = vmatpush.msra.mxu3 %v380_v42  ;;  %446 = vmatpush.msra.mxu2 %v363_v44  ;;  %v343_v2 = vld [vmem:[#allocation5 + $0x80] sm:$0xff] }
  0x61   : > { %425 = vmatpush.msra.mxu1 %v348_v43  ;;  %406 = vmatpush.msra.mxu0 %v331_v45  ;;  %v715_v4 = vld [vmem:[%s1134_s2] ss:$0 sm:$0xff]  ;;  %v483_v20 = vadd.f32 %v719_v16, %v482_v19 }
  0x62   : > { %466 = vmatpush.msra.mxu3 %v379_v47  ;;  %447 = vmatpush.msra.mxu2 %v362_v46  ;;  %v475_v12 = vld [vmem:[%s1077_s20] sm:$0xff]  ;;  %s832_s20 = scalar_lea.hbm %s1138_s6, 16 }
  0x63   : > { %426 = vmatpush.msra.mxu1 %v347_v48  ;;  %407 = vmatpush.msra.mxu0 %v330_v49  ;;  %v485_v21 = vsel %vm484_vm0, %v719_v16, %v483_v20  ;;  %v716_v35 = vld [vmem:[%s1136_s4] ss:$0 sm:$0xff]  ;;  %p834_p13 = scmp.lt.s32.totalorder %s832_s20, %s828_s27 }
  0x64   : > { %467 = vmatpush.msra.mxu3 %v378_v50  ;;  %448 = vmatpush.msra.mxu2 %v361_v52  ;;  %v717_v38 = vld [vmem:[%s1137_s5] ss:$0 sm:$0xff] }
  0x65   : > { %427 = vmatpush.msra.mxu1 %v346_v51  ;;  %408 = vmatpush.msra.mxu0 %v329_v53  ;;  %p835_p0 = por %p834_p13, %p833_p1 }
  0x66   : > { %468 = vmatpush.msra.mxu3 %v377_v54  ;;  %449 = vmatpush.msra.mxu2 %v360_v56 }
  0x67   : > { %428 = vmatpush.msra.mxu1 %v345_v55  ;;  %409 = vmatpush.msra.mxu0 %v328_v57  ;;  %p836_p5 = pnand %p835_p0, %p831_p2 }
  0x68   : > { %469 = vmatpush.msra.mxu3 %v376_v58  ;;  %450 = vmatpush.msra.mxu2 %v359_v60 }
  0x69   : > { %429 = vmatpush.msra.mxu1 %v344_v59  ;;  %410 = vmatpush.msra.mxu0 %v327_v61 }
  0x6a   : > { %451 = vmatmul.f32.vlgmr.msra.gmra.mxu2 %v325_v62  ;;  %470 = vmatpush.msra.mxu3 %v375_v63 }
  0x6b   : > { %411 = vmatmul.f32.vlgmr.msra.gmra.mxu0 %v323_v0  ;;  %471 = vmatmul.f32.vlgmr.msra.gmra.mxu3 %v326_v1 }
  0x6c   : > { %430 = vmatpush.msra.mxu1 %v343_v2 }
  0x6d   : > { %431 = vmatmul.f32.vlgmr.msra.gmra.mxu1 %v324_v3 }
  0xe8   : > { %v412_v5 = vpop.f32.mrf.mxu0 }
  0xe9   : > { %v413_v6 = vadd.f32 %v715_v4, %v412_v5 }
  0xea   : > { %v432_v7 = vpop.f32.mrf.mxu1 }
  0xeb   : > { %v433_v8 = vadd.f32 %v432_v7, %v413_v6 }
  0xed   : > { %v452_v9 = vpop.f32.mrf.mxu2 }
  0xee   : > { %v453_v10 = vadd.f32 %v452_v9, %v433_v8  ;;  %v472_v11 = vpop.f32.mrf.mxu3 }
  0xf0   : > { %v473_v13 = vadd.f32 %v472_v11, %v453_v10 }
  0xf2   : > { %v476_v14 = vadd.f32 %v475_v12, %v473_v13 }
  0xf4   : > { %477 = vadd.xlane.f32.xlu0 %v476_v14 }
 0x167   : > { %v478_v22 = vpop.xlane.xlu0 %477 }
 0x168   : > { %v486_v23 = vmul.f32 %v485_v21, %v478_v22 }
 0x16a   : > { %v487_v24 = vsub.f32 %v476_v14, %v486_v23 }
 0x16c   : > { %v488_v25 = vmul.f32 %v487_v24, %v487_v24 }
 0x16e   : > { %489 = vadd.xlane.f32.xlu0 %v488_v25 }
 0x1e1   : > { %v490_v26 = vpop.xlane.xlu0 %489 }
 0x1e2   : > { %v491_v27 = vmul.f32 %v490_v26, %v485_v21 }
 0x1e4   : > { %v492_v28 = vadd.f32 1e-12, %v491_v27 }
 0x1e6   : > { %720 = vrsqrt.f32 %v492_v28  ;;  %vm499_vm2 = vweird.f32 %v492_v28 }
 0x1ec   : > { %v721_v29 = vpop.eup %720 }
 0x1ed   : > { %v494_v30 = vmul.f32 %v721_v29, %v492_v28  ;;  %vm500_vm1 = vweird.f32 %v721_v29 }
 0x1ee   : > { %vm501_vm3 = vmor %vm499_vm2, %vm500_vm1 }
 0x1ef   : > { %v495_v31 = vmul.f32 %v721_v29, %v494_v30 }
 0x1f1   : > { %v496_v32 = vmul.f32 0.5, %v495_v31 }
 0x1f3   : > { %v497_v33 = vsub.f32 1.5, %v496_v32 }
 0x1f5   : > { %v498_v34 = vmul.f32 %v721_v29, %v497_v33 }
 0x1f7   : > { %v502_v36 = vsel %vm501_vm3, %v721_v29, %v498_v34 }
 0x1f8   : > { %v503_v37 = vmul.f32 %v502_v36, %v487_v24 }
 0x1fa   : > { %v508_v39 = vmul.f32 %v716_v35, %v503_v37 }
 0x1fc   : > { %v513_v40 = vadd.f32 %v717_v38, %v508_v39 }
 0x1fe   : > { %514 = vst [vmem:[%s322_s25] sm:$0xff] %v513_v40 }
 0x1ff   : > { %839 = shalt.err (!%p836_p5)
}
 0x200   : > { %658 = dma.vmem_to_hbm [thread:$0]  (%p970_p6), %s529_s12, 128, %s531_s19, %s516_s13  }
 0x201 PF: > { %s542_s23 = sand.u32 1, %s874_s21   ;;  %p1156_p7 = scmp.ge.s32.totalorder %s886_s24, 2 }
 0x202   : > { %s543_s10 = scalar_lea.sflag [#allocation4], %s542_s23 }
 0x203   : > { %p672_p9 = pnand %p1156_p7, %p979_p10 }
 0x205   : > { %p673_p8 = pneg %p672_p9 }
 0x207   : > { %869 = dma.done.wait (%p673_p8), %s543_s10, 128  }
 0x208   : > { %871 = vsyncadd (%p673_p8), %s543_s10, 4294967168  ;;  %s1157_s24 = sld [smem:[#allocation14_spill]]  ;;  %s1160_s21 = smov %s878_s22 }
 0x209   : > { %s1158_s16 = sld [smem:[#allocation13_spill]] }
 0x20a   : > { %s1159_s23 = sld [smem:[#allocation15_spill]] }
 0x20e   : > { %p20_p4 = scmp.ge.s32.totalorder %s1157_s24, 4  }
 0x20f   : > { %s1161_s22 = smov %s1158_s16 }
 0x210   :  { %22 = sbr.rel (!%p20_p4) target bundleno = 9 (0x9), region = 104 }
 0x215   :  { %549 = vsyncpa [#allocation3], 1 }
 0x216   :  { %551 = vsyncpa [#allocation3 + $0x1], 1 }
 0x217   :  { %552 = vsyncpa [#allocation6], 1 }
 0x218   :  { %553 = vsyncpa [#allocation4], 1 }
 0x219   :  { %555 = vsyncpa [#allocation4 + $0x1], 1 }

</bundles_post_ra>
